<compile_context>
chip_gen: v5e
topology: v5e:2x2
jax: 0.10.0
libtpu: 0.0.40
codegen_flags: <defaults>
</compile_context>

<pallas_src>
import functools

import jax
import jax.numpy as jnp
from jax.experimental import pallas as pl
from jax.experimental.pallas import tpu as pltpu


def _label_smoothing_kernel(pred_ref, tgt_ref, loss_ref, *, smoothing, confidence,
                            num_classes):
    f32 = jnp.float32
    pred = pred_ref[...]                                                 # (tile_n, C)
    # TODO(synk): PyTorch prints a runtime warning when target.max() >= classes;
    # here we only apply the equivalent clamp.
    tgt = jnp.clip(tgt_ref[...].astype(jnp.int32), 0, num_classes - 1)   # (tile_n, 1)

    # element-wise work stays in bf16 when the input is bf16 (bf16 VPU/EUP on
    # v6e/v7x); anything else is promoted to f32. Reductions accumulate in f32.
    ew_dtype = pred.dtype if pred.dtype == jnp.bfloat16 else f32
    pred_ew = pred.astype(ew_dtype)

    # class-axis reductions straight off the raw tile (no materialized z = pred - m)
    m = jnp.max(pred_ew, axis=1, keepdims=True).astype(f32)              # (tile_n, 1)
    sum_pred = jnp.sum(pred_ew, axis=1, keepdims=True, dtype=f32)        # (tile_n, 1)
    cols = jax.lax.broadcasted_iota(jnp.int32, pred_ew.shape, 1)         # (tile_n, C)
    pred_t = jnp.sum(jnp.where(cols == tgt, pred_ew, 0.0),
                     axis=1, keepdims=True, dtype=f32)                   # (tile_n, 1)

    # LSE: the subtraction is fused into the exp pass; reduce accumulates in f32
    z_exp = jnp.exp(pred_ew - m.astype(ew_dtype))                        # (tile_n, C)
    lse = jnp.log(jnp.sum(z_exp, axis=1, keepdims=True, dtype=f32))      # (tile_n, 1)

    sum_z = sum_pred - f32(num_classes) * m      # = sum_j (pred_j - m)
    z_t = pred_t - m                             # = pred[target] - m

    # loss_row = -sum_j true_dist_j * logp_j
    #          = sv*(C*lse - sum_z) + (conf - sv)*(lse - z_t)
    sv = smoothing / (num_classes - 1)
    loss_ref[...] = (f32(sv) * (f32(num_classes) * lse - sum_z)
                     + f32(confidence - sv) * (lse - z_t))


def _round_up(x, m):
    return ((x + m - 1) // m) * m


def _pick_tile_n(n_rows, n_classes):
    # Budget by the f32 working set (intermediates are f32 even for bf16 input):
    # ~2 MiB per full-width f32 tile, capped at 1024 rows, so double-buffered
    # inputs + a few f32 temporaries stay well inside v7x's 64 MiB/TC VMEM.
    budget_bytes = 2 * 1024 * 1024
    rows = budget_bytes // max(1, n_classes * 4)
    rows = min(rows, 1024)
    # cap so num_tiles >= 2: the single "parallel" grid axis can then be split
    # across both TensorCores on v7x (no effect on 1-TC v5e/v6e)
    rows = min(rows, _round_up(max(1, -(-n_rows // 2)), 8))
    rows = max(8, (rows // 8) * 8)
    return int(rows)
    # TODO(synk): for vocab-scale C, add an inner "arbitrary" class-axis grid
    # dim with online/two-pass LSE so v7x's 64 MiB VMEM budget holds.


def label_smoothing_loss(pred, target, *, classes, smoothing=0.1, tile_n=None):
    """pred: (N, C) float, target: (N,) int. Returns scalar float32 loss."""
    N, C = pred.shape
    assert C == classes
    assert classes >= 2, "smoothing/(classes-1) is undefined for classes < 2"
    confidence = 1.0 - smoothing

    if tile_n is None:
        tile_n = _pick_tile_n(N, C)
    num_tiles = pl.cdiv(N, tile_n)

    target2d = target.astype(jnp.int32).reshape(N, 1)
    itemsize = jnp.dtype(pred.dtype).itemsize

    kernel = functools.partial(
        _label_smoothing_kernel,
        smoothing=float(smoothing),
        confidence=float(confidence),
        num_classes=int(classes),
    )

    # VMEM: double-buffered input tiles + a few full-width f32 temporaries.
    in_tile_bytes = tile_n * C * itemsize
    f32_tile_bytes = tile_n * C * 4
    working_set = 2 * in_tile_bytes + 4 * f32_tile_bytes + 8 * tile_n * 4
    vmem_limit = int(min(max(2 * working_set, 16 * 1024 * 1024), 64 * 1024 * 1024))

    cost = pl.CostEstimate(
        flops=int(7 * N * C),
        transcendentals=int(N * (C + 1)),
        bytes_accessed=int(N * C * itemsize + N * 4 + N * 4),
    )

    # NOTE: no padding of pred/target -- Pallas clips the partial edge block,
    # and its out-of-range rows are row-independent garbage that never lands
    # in the (N, 1) output.
    per_row = pl.pallas_call(
        kernel,
        out_shape=jax.ShapeDtypeStruct((N, 1), jnp.float32),
        grid_spec=pltpu.PrefetchScalarGridSpec(
            num_scalar_prefetch=0,
            grid=(num_tiles,),
            in_specs=[
                pl.BlockSpec((tile_n, C), lambda i: (i, 0)),
                pl.BlockSpec((tile_n, 1), lambda i: (i, 0)),
            ],
            # each grid step owns its own output block -> no serialization
            out_specs=pl.BlockSpec((tile_n, 1), lambda i: (i, 0)),
        ),
        compiler_params=pltpu.CompilerParams(
            dimension_semantics=("parallel",),
            vmem_limit_bytes=vmem_limit,
        ),
        cost_estimate=cost,
    )(pred, target2d)

    # final mean over exactly the N real rows -- trivial XLA reduce
    return jnp.sum(per_row) / jnp.float32(N)


def _reference(pred, target, classes, smoothing=0.1):
    confidence = 1.0 - smoothing
    logp = jax.nn.log_softmax(pred.astype(jnp.float32), axis=1)
    tgt = jnp.clip(target, 0, classes - 1)
    true_dist = jnp.full_like(logp, smoothing / (classes - 1))
    true_dist = true_dist.at[jnp.arange(pred.shape[0]), tgt].set(confidence)
    return jnp.mean(jnp.sum(-true_dist * logp, axis=1))


if __name__ == "__main__":
    key = jax.random.PRNGKey(0)
    k1, k2 = jax.random.split(key)

    N, C = 16, 32            # batch, classes
    pred = jax.random.normal(k1, (N, C), dtype=jnp.float32)
    target = jax.random.randint(k2, (N,), 0, C, dtype=jnp.int32)

    loss = jax.block_until_ready(
        label_smoothing_loss(pred, target, classes=C, smoothing=0.1))
    ref = _reference(pred, target, C, smoothing=0.1)
    assert jnp.allclose(loss, ref, atol=1e-5, rtol=1e-5), (loss, ref)

    # clamp path: a target >= classes must be clamped like the PyTorch fallback
    target_oob = target.at[0].set(C + 3)
    loss2 = jax.block_until_ready(
        label_smoothing_loss(pred, target_oob, classes=C, smoothing=0.1))
    ref2 = _reference(pred, target_oob, C, smoothing=0.1)
    assert jnp.allclose(loss2, ref2, atol=1e-5, rtol=1e-5), (loss2, ref2)

    # ragged batch (N not a multiple of tile_n): now runs without wrapper-side padding
    N3 = 13
    pred3 = jax.random.normal(k1, (N3, C), dtype=jnp.float32)
    target3 = jax.random.randint(k2, (N3,), 0, C, dtype=jnp.int32)
    loss3 = jax.block_until_ready(
        label_smoothing_loss(pred3, target3, classes=C, smoothing=0.1))
    ref3 = _reference(pred3, target3, C, smoothing=0.1)
    assert jnp.allclose(loss3, ref3, atol=1e-5, rtol=1e-5), (loss3, ref3)

    # bf16 input exercises the bf16 element-wise path (reductions stay f32)
    pred_bf16 = pred.astype(jnp.bfloat16)
    loss4 = jax.block_until_ready(
        label_smoothing_loss(pred_bf16, target, classes=C, smoothing=0.1))
    ref4 = _reference(pred_bf16.astype(jnp.float32), target, C, smoothing=0.1)
    assert jnp.allclose(loss4, ref4, atol=5e-2, rtol=5e-2), (loss4, ref4)

    print("KERNEL_OK")
</pallas_src>

<mosaic_0001>
module attributes {stable_mosaic.version = 11 : i64} {
  func.func @_label_smoothing_kernel(%arg0: i32, %arg1: memref<8x32xf32, #tpu.memory_space<vmem>>, %arg2: memref<8x1xi32, #tpu.memory_space<vmem>>, %arg3: memref<8x1xf32, #tpu.memory_space<vmem>>) attributes {dimension_semantics = [#tpu.dimension_semantics<parallel>], iteration_bounds = array<i64: 2>, scalar_prefetch = 0 : i64, scratch_operands = 0 : i64, tpu.core_type = #tpu.core_type<tc>, window_params = [{transform_indices = @transform_0, window_bounds = array<i64: 8, 32>}, {transform_indices = @transform_1, window_bounds = array<i64: 8, 1>}, {transform_indices = @transform_2, window_bounds = array<i64: 8, 1>}]} {
    %c0 = arith.constant 0 : index
    %c0_0 = arith.constant 0 : index
    %0 = vector.load %arg1[%c0, %c0_0] : memref<8x32xf32, #tpu.memory_space<vmem>>, vector<8x32xf32>
    %c0_1 = arith.constant 0 : index
    %c0_2 = arith.constant 0 : index
    %1 = vector.load %arg2[%c0_1, %c0_2] : memref<8x1xi32, #tpu.memory_space<vmem>>, vector<8x1xi32>
    %c0_i32 = arith.constant 0 : i32
    %c31_i32 = arith.constant 31 : i32
    %2 = vector.broadcast %c0_i32 : i32 to vector<8x1xi32>
    %3 = arith.maxsi %2, %1 : vector<8x1xi32>
    %4 = vector.broadcast %c31_i32 : i32 to vector<8x1xi32>
    %5 = arith.minsi %4, %3 : vector<8x1xi32>
    %cst = arith.constant dense<0xFF800000> : vector<8xf32>
    %6 = vector.multi_reduction <maximumf>, %0, %cst [1] : vector<8x32xf32> to vector<8xf32>
    %7 = vector.shape_cast %6 : vector<8xf32> to vector<8x1xf32>
    %cst_3 = arith.constant dense<0.000000e+00> : vector<8xf32>
    %8 = vector.multi_reduction <add>, %0, %cst_3 [1] : vector<8x32xf32> to vector<8xf32>
    %9 = vector.shape_cast %8 : vector<8xf32> to vector<8x1xf32>
    %10 = tpu.iota {dimensions = array<i32: 1>} : vector<8x32xi32>
    %11 = vector.broadcast %5 : vector<8x1xi32> to vector<8x32xi32>
    %12 = arith.cmpi eq, %10, %11 : vector<8x32xi32>
    %cst_4 = arith.constant 0.000000e+00 : f32
    %13 = vector.broadcast %cst_4 : f32 to vector<8x32xf32>
    %14 = arith.select %12, %0, %13 : vector<8x32xi1>, vector<8x32xf32>
    %cst_5 = arith.constant dense<0.000000e+00> : vector<8xf32>
    %15 = vector.multi_reduction <add>, %14, %cst_5 [1] : vector<8x32xf32> to vector<8xf32>
    %16 = vector.shape_cast %15 : vector<8xf32> to vector<8x1xf32>
    %17 = vector.broadcast %7 : vector<8x1xf32> to vector<8x32xf32>
    %18 = arith.subf %0, %17 : vector<8x32xf32>
    %19 = math.exp %18 : vector<8x32xf32>
    %cst_6 = arith.constant dense<0.000000e+00> : vector<8xf32>
    %20 = vector.multi_reduction <add>, %19, %cst_6 [1] : vector<8x32xf32> to vector<8xf32>
    %21 = vector.shape_cast %20 : vector<8xf32> to vector<8x1xf32>
    %22 = math.log %21 : vector<8x1xf32>
    %cst_7 = arith.constant 3.200000e+01 : f32
    %23 = vector.broadcast %cst_7 : f32 to vector<8x1xf32>
    %24 = arith.mulf %23, %7 : vector<8x1xf32>
    %25 = arith.subf %9, %24 : vector<8x1xf32>
    %26 = arith.subf %16, %7 : vector<8x1xf32>
    %cst_8 = arith.constant 3.200000e+01 : f32
    %27 = vector.broadcast %cst_8 : f32 to vector<8x1xf32>
    %28 = arith.mulf %27, %22 : vector<8x1xf32>
    %29 = arith.subf %28, %25 : vector<8x1xf32>
    %cst_9 = arith.constant 0.0032258064 : f32
    %30 = vector.broadcast %cst_9 : f32 to vector<8x1xf32>
    %31 = arith.mulf %30, %29 : vector<8x1xf32>
    %32 = arith.subf %22, %26 : vector<8x1xf32>
    %cst_10 = arith.constant 0.896774172 : f32
    %33 = vector.broadcast %cst_10 : f32 to vector<8x1xf32>
    %34 = arith.mulf %33, %32 : vector<8x1xf32>
    %35 = arith.addf %31, %34 : vector<8x1xf32>
    %c0_11 = arith.constant 0 : index
    %c0_12 = arith.constant 0 : index
    %36 = vector.load %arg3[%c0_11, %c0_12] : memref<8x1xf32, #tpu.memory_space<vmem>>, vector<8x1xf32>
    tpu.vector_store %arg3[%c0_11, %c0_12], %35 {strides = array<i32>} : memref<8x1xf32, #tpu.memory_space<vmem>>, vector<8x1xf32>,
    return
  }
  func.func @transform_0(%arg0: i32) -> (i32, i32) {
    %c0_i32 = arith.constant 0 : i32
    %c0_i32_0 = arith.constant 0 : i32
    return %arg0, %c0_i32 : i32, i32
  }
  func.func @transform_1(%arg0: i32) -> (i32, i32) {
    %c0_i32 = arith.constant 0 : i32
    %c0_i32_0 = arith.constant 0 : i32
    return %arg0, %c0_i32 : i32, i32
  }
  func.func @transform_2(%arg0: i32) -> (i32, i32) {
    %c0_i32 = arith.constant 0 : i32
    %c0_i32_0 = arith.constant 0 : i32
    return %arg0, %c0_i32 : i32, i32
  }
}

</mosaic_0001>

<bundles_post_ra>
// kernel: tpu_custom_call.1
= control target key start
LH: loop header
LB: loop body
LE: loop exit
PB: predicated region body
PF: predicated region fallthrough
CT: control target
= control target key end

     0   :  { %s311_s9 = smov 0   ;;  %s340_s0 = inlined_call_operand.vmem [shape: f32[16,32], index: 0, kind: input, shape index: {}]   ;;  %s341_s1 = inlined_call_operand.vmem [shape: s32[16,1], index: 1, kind: input, shape index: {}]   ;;  %s342_s2 = inlined_call_operand.vmem [shape: f32[16,1], index: 2, kind: output, shape index: {}]  }
   0x1 LB: > { %s263_s10 = sadd.s32 4294967295, %s293_s9   ;;  %p267_p0 = scmp.ge.s32.totalorder %s293_s9, 1  ;;  %s293_s9 = sphi %s311_s9, %s12_s9  }
   0x2   : > { %p120_p1 = scmp.lt.s32.totalorder %s293_s9, 3 }
   0x4   : > { %p121_p2 = pnand %p267_p0, %p120_p1 }
   0x5   : > { %p144_p3 = scmp.lt.s32.totalorder (!%p121_p2), %s263_s10, 1 }
   0x6   : > { %124 = sbr.rel (%p121_p2) target bundleno = 279 (0x117), region = 28 }
   0xb   : > { %v295_v0 = vmov 0   ;;  %s344_s10 = smov (!%p144_p3, %s263_s10), 1  ;;  %vm162_vm0 = vcmask 261120   ;;  %v169_v11 = vlaneseq  ;;  %vm196_vm4 = vcmask 7168  }
   0xc   : > { %282 = vset.pattern.permute.xlu0 %v295_v0  ;;  %s319_s11 = sshll.u32 %s344_s10, 3 }
   0xd   : > { %s147_s14 = scalar_lea.vmem %s340_s0, %s319_s11  ;;  %s151_s17 = scalar_lea.vmem %s341_s1, %s319_s11  ;;  %v170_v12 = vand.u32 127, %v169_v11 }
   0xe   : > { %v156_v1 = vld [vmem:[%s147_s14] sm:$0xff]  ;;  %s155_s20 = scalar_lea.vmem %s342_s2, %s319_s11 }
   0xf   : > { %v163_v2 = vsel %vm162_vm0, %v156_v1, -inf  ;;  %v157_v3 = vld [vmem:[%s151_s17] sm:$0xff]  ;;  %v166_v13 = vsel %vm162_vm0, %v156_v1, 0.0 }
  0x10   : > { %164 = vmax.xlane.f32.xlu0 %v163_v2  ;;  %vm158_vm1 = vcmp.gt.s32.totalorder %v157_v3, 0 }
  0x11   : > { %v159_v4 = vsel %vm158_vm1, %v157_v3, 0 }
  0x12   : > { %vm160_vm2 = vcmp.lt.s32.totalorder %v159_v4, 31 }
  0x13   : > { %v161_v5 = vsel %vm160_vm2, %v159_v4, 31 }
  0x24   : > { %172 = vperm.xlu0 %282, %v161_v5  }
  0x83   : > { %v165_v6 = vpop.xlane.xlu0 %164 }
  0x84   : > { %v179_v7 = vsub.f32 %v156_v1, %v165_v6  ;;  %v187_v19 = vmul.f32 32.0, %v165_v6 }
  0x86   : > { %v180_v8 = vmul.f32 1.442695, %v179_v7 }
  0x88   : > { %283 = vpow2.f32 %v180_v8 }
  0x8e   : > { %v284_v9 = vpop.eup %283 }
  0x8f   : > { %v182_v10 = vsel %vm162_vm0, %v284_v9, 0.0 }
  0x90   : > { %183 = vadd.xlane.f32.xlu1 %v182_v10 }
  0x96   : > { %v173_v14 = vpop.permute.xlu0 %172 }
  0x97   : > { %vm174_vm3 = vcmp.eq.s32.totalorder %v170_v12, %v173_v14 }
  0x98   : > { %167 = vadd.xlane.f32.xlu1 %v166_v13  ;;  %v175_v15 = vsel %vm174_vm3, %v156_v1, 0.0 }
  0x99   : > { %v176_v16 = vsel %vm162_vm0, %v175_v15, 0.0 }
  0x9a   : > { %177 = vadd.xlane.f32.xlu2 %v176_v16 }
 0x103   : > { %v184_v17 = vpop.xlane.xlu1 %183 }
 0x104   : > { %285 = vlog2.f32 %v184_v17 }
 0x10a   : > { %v286_v18 = vpop.eup %285 }
 0x10b   : > { %v186_v20 = vmul.f32 0.6931472, %v286_v18  ;;  %v168_v21 = vpop.xlane.xlu1 %167 }
 0x10c   : > { %v188_v22 = vsub.f32 %v168_v21, %v187_v19 }
 0x10d   : > { %v190_v23 = vmul.f32 32.0, %v186_v20  ;;  %v178_v24 = vpop.xlane.xlu2 %177 }
 0x10e   : > { %v189_v25 = vsub.f32 %v178_v24, %v165_v6 }
 0x10f   : > { %v191_v26 = vsub.f32 %v190_v23, %v188_v22 }
 0x110   : > { %v193_v27 = vsub.f32 %v186_v20, %v189_v25 }
 0x111   : > { %v192_v28 = vmul.f32 0.0032258064, %v191_v26 }
 0x112   : > { %v194_v29 = vmul.f32 0.8967742, %v193_v27 }
 0x114   : > { %v195_v30 = vadd.f32 %v194_v29, %v192_v28 }
 0x116   : > { %197 = vst.msk [vmem:[%s155_s20] sm:$0xff] %vm196_vm4, %v195_v30 }
 0x117 PF: > { %s12_s9 = sadd.s32 1, %s293_s9  }
 0x118   : > { %p9_p4 = scmp.ge.s32.totalorder %s12_s9, 4  }
 0x11a   :  { %11 = sbr.rel (!%p9_p4) target bundleno = 1 (0x1), region = 61 }

</bundles_post_ra>
